<compile_context>
chip_gen: v5e
topology: v5e:2x2
jax: 0.10.0
libtpu: 0.0.40
codegen_flags: <defaults>
</compile_context>

<pallas_src>
import functools

import jax
import jax.numpy as jnp
from jax.experimental import pallas as pl
from jax.experimental.pallas import tpu as pltpu


def _round_up(x, m):
    return ((x + m - 1) // m) * m


# -------------------------------- kernel ------------------------------------

def _classifier_kernel(x_ref, w_in_ref, b1_ref, w_fuse_ref, wo_ref, bo_ref, out_ref):
    """One batch tile of the fused classifier MLP.

    x_ref      : (TILE, K_pad)        concatenated [h_lnc|h_mi|h_mr|h_dis], zero-padded
    w_in_ref   : (K_pad, 2*H_pad)     [:, :H_pad] -> triplet path, [:, H_pad:] -> disease term
    b1_ref     : (1, 2*H_pad)         [bt_pad | bd_pad]   (f32)
    w_fuse_ref : (H_pad, H_pad)       Wd[:hidden, :] zero-padded
    wo_ref     : (1, H_pad)           Wo^T zero-padded    (f32)
    bo_ref     : (1, 1)               (f32)
    out_ref    : (TILE, 1)            probabilities       (f32)
    """
    h_pad = w_fuse_ref.shape[0]
    f32 = jnp.float32

    # One wide MXU pass: K = 4*in_dim (lane-dense), N = 2*H_pad.
    pre = jnp.dot(x_ref[...], w_in_ref[...], preferred_element_type=f32) + b1_ref[...]

    # Triplet path (bias bt already folded into the first half of b1).
    rna_emb = jnp.maximum(pre[:, :h_pad], 0.0)

    # Fusion: rna_emb @ Wd[:hidden] + (h_dis @ W_dis @ Wd[hidden:]) + bd
    # (second + third terms live in pre[:, h_pad:]).
    fuse_pre = (
        jnp.dot(rna_emb.astype(w_fuse_ref.dtype), w_fuse_ref[...],
                preferred_element_type=f32)
        + pre[:, h_pad:]
    )
    fuse_emb = jnp.maximum(fuse_pre, 0.0)

    # Final projection to a single score: VPU multiply + lane reduce instead of
    # an N=1 MXU matmul (padded Wo lanes are zero so they contribute nothing).
    score = jnp.sum(fuse_emb * wo_ref[...], axis=-1, keepdims=True) + bo_ref[...]
    out_ref[...] = jax.nn.sigmoid(score).astype(out_ref.dtype)


# ------------------------------- wrapper -------------------------------------

@functools.partial(jax.jit, static_argnames=("tile",))
def rna_disease_classifier(h_lnc, h_mi, h_mr, h_dis, fparams, *, tile=1024):
    """Forward pass. Inputs: (N, in_dim) each. Returns probabilities (N, 1) f32."""
    n, in_dim = h_lnc.shape
    w_in = fparams["W_in"]       # (K_pad, 2*H_pad)
    b1 = fparams["b1"]           # (1, 2*H_pad)  f32
    w_fuse = fparams["W_fuse"]   # (H_pad, H_pad)
    wo = fparams["Wo_row"]       # (1, H_pad)    f32
    bo = fparams["bo"]           # (1, 1)        f32

    k_pad = w_in.shape[0]
    h_pad = w_fuse.shape[0]
    compute_dtype = w_in.dtype
    k = 4 * in_dim

    # Tile must be a multiple of 8 (sublane) and no larger than the padded batch.
    tile = max(8, _round_up(int(tile), 8))
    tile = min(tile, _round_up(n, 8))
    n_pad = _round_up(n, tile)

    # Lane-dense single input stream: concat + pad batch/width with zeros.
    x = jnp.concatenate([h_lnc, h_mi, h_mr, h_dis], axis=1).astype(compute_dtype)
    x = jnp.pad(x, ((0, n_pad - n), (0, k_pad - k)))

    # Scoped VMEM budget sized to the tile (double-buffered x/out streams,
    # resident weights, f32 intermediates) with 2x margin, clamped to a
    # chip-safe range (<= 32 MiB so it fits v5e/v6e defaults and v7x's 64 MiB).
    itemsize = jnp.dtype(compute_dtype).itemsize
    weight_bytes = (k_pad * 2 * h_pad + h_pad * h_pad) * itemsize + (3 * h_pad + 1) * 4
    stream_bytes = 2 * tile * k_pad * itemsize + 2 * tile * 4
    interm_bytes = tile * (5 * h_pad) * 4
    vmem_limit = int(min(max(2 * (weight_bytes + stream_bytes + interm_bytes),
                             16 * 1024 * 1024), 32 * 1024 * 1024))

    out = pl.pallas_call(
        _classifier_kernel,
        out_shape=jax.ShapeDtypeStruct((n_pad, 1), jnp.float32),
        grid_spec=pltpu.PrefetchScalarGridSpec(
            num_scalar_prefetch=0,
            grid=(n_pad // tile,),
            in_specs=[
                pl.BlockSpec((tile, k_pad), lambda i: (i, 0)),       # x (tiled)
                pl.BlockSpec((k_pad, 2 * h_pad), lambda i: (0, 0)),  # W_in (resident)
                pl.BlockSpec((1, 2 * h_pad), lambda i: (0, 0)),      # b1
                pl.BlockSpec((h_pad, h_pad), lambda i: (0, 0)),      # W_fuse
                pl.BlockSpec((1, h_pad), lambda i: (0, 0)),          # Wo_row
                pl.BlockSpec((1, 1), lambda i: (0, 0)),              # bo
            ],
            out_specs=pl.BlockSpec((tile, 1), lambda i: (i, 0)),
        ),
        compiler_params=pltpu.CompilerParams(
            dimension_semantics=("parallel",),
            vmem_limit_bytes=vmem_limit,
        ),
    )(x, w_in, b1, w_fuse, wo, bo)
    return out[:n]


# ------------------------- parameter init / folding --------------------------

def _xavier_normal(key, shape):
    fan_in, fan_out = shape[0], shape[1]
    std = jnp.sqrt(2.0 / (fan_in + fan_out))
    return std * jax.random.normal(key, shape, dtype=jnp.float32)


def _linear_init(key, in_features, out_features):
    # mimic torch.nn.Linear default init; stored pre-transposed (in, out).
    kw, kb = jax.random.split(key)
    bound = 1.0 / jnp.sqrt(jnp.float32(in_features))
    w = jax.random.uniform(kw, (in_features, out_features), jnp.float32, -bound, bound)
    b = jax.random.uniform(kb, (1, out_features), jnp.float32, -bound, bound)
    return w, b


def init_params(key, in_dim, hidden_dim):
    keys = jax.random.split(key, 7)
    wt, bt = _linear_init(keys[4], 3 * in_dim, hidden_dim)
    wd, bd = _linear_init(keys[5], hidden_dim + in_dim, hidden_dim)
    wo, bo = _linear_init(keys[6], hidden_dim, 1)
    return {
        "W_lnc": _xavier_normal(keys[0], (in_dim, in_dim)),
        "W_mi": _xavier_normal(keys[1], (in_dim, in_dim)),
        "W_mr": _xavier_normal(keys[2], (in_dim, in_dim)),
        "W_dis": _xavier_normal(keys[3], (in_dim, in_dim)),
        "Wt": wt, "bt": bt,
        "Wd": wd, "bd": bd,
        "Wo": wo, "bo": bo,
    }


def fold_params(p, in_dim, hidden, compute_dtype=jnp.float32):
    """One-time offline fold: per-type weighting matmuls absorbed into the
    downstream Linear weights, stacked, and zero-padded to MXU-friendly shapes."""
    h_pad = max(128, _round_up(hidden, 128))
    k_pad = _round_up(4 * in_dim, 128)
    wt, wd = p["Wt"], p["Wd"]

    w_in = jnp.zeros((k_pad, 2 * h_pad), jnp.float32)
    w_in = w_in.at[0 * in_dim:1 * in_dim, :hidden].set(p["W_lnc"] @ wt[0 * in_dim:1 * in_dim])
    w_in = w_in.at[1 * in_dim:2 * in_dim, :hidden].set(p["W_mi"] @ wt[1 * in_dim:2 * in_dim])
    w_in = w_in.at[2 * in_dim:3 * in_dim, :hidden].set(p["W_mr"] @ wt[2 * in_dim:3 * in_dim])
    w_in = w_in.at[3 * in_dim:4 * in_dim, h_pad:h_pad + hidden].set(
        p["W_dis"] @ wd[hidden:hidden + in_dim])

    b1 = jnp.zeros((1, 2 * h_pad), jnp.float32)
    b1 = b1.at[:, :hidden].set(p["bt"])
    b1 = b1.at[:, h_pad:h_pad + hidden].set(p["bd"])

    w_fuse = jnp.zeros((h_pad, h_pad), jnp.float32).at[:hidden, :hidden].set(wd[:hidden])
    wo_row = jnp.zeros((1, h_pad), jnp.float32).at[:, :hidden].set(p["Wo"].T)

    return {
        "W_in": w_in.astype(compute_dtype),
        "b1": b1,
        "W_fuse": w_fuse.astype(compute_dtype),
        "Wo_row": wo_row,
        "bo": p["bo"],
    }


# ----------------------------- pure-JAX reference ----------------------------

def _reference(h_lnc, h_mi, h_mr, h_dis, p):
    lnc_w = h_lnc @ p["W_lnc"]
    mi_w = h_mi @ p["W_mi"]
    mr_w = h_mr @ p["W_mr"]
    rna_cat = jnp.concatenate([lnc_w, mi_w, mr_w], axis=-1)
    rna_emb = jax.nn.relu(rna_cat @ p["Wt"] + p["bt"])
    dis_w = h_dis @ p["W_dis"]
    dis_cat = jnp.concatenate([rna_emb, dis_w], axis=-1)
    fuse_emb = jax.nn.relu(dis_cat @ p["Wd"] + p["bd"])
    return jax.nn.sigmoid(fuse_emb @ p["Wo"] + p["bo"])


if __name__ == "__main__":
    batch, in_dim, hidden_dim = 300, 32, 32   # non-multiple-of-tile batch on purpose

    key = jax.random.PRNGKey(0)
    k_params, k_lnc, k_mi, k_mr, k_dis = jax.random.split(key, 5)

    params = init_params(k_params, in_dim, hidden_dim)
    h_lnc = jax.random.normal(k_lnc, (batch, in_dim), dtype=jnp.float32)
    h_mi = jax.random.normal(k_mi, (batch, in_dim), dtype=jnp.float32)
    h_mr = jax.random.normal(k_mr, (batch, in_dim), dtype=jnp.float32)
    h_dis = jax.random.normal(k_dis, (batch, in_dim), dtype=jnp.float32)

    # Fold weights once (offline); f32 compute here for a tight reference check.
    # For v6e/v7x throughput, pass compute_dtype=jnp.bfloat16 and loosen tolerance.
    folded = fold_params(params, in_dim, hidden_dim, compute_dtype=jnp.float32)

    # tile=128 exercises a multi-step (parallel) grid with batch padding.
    prob = rna_disease_classifier(h_lnc, h_mi, h_mr, h_dis, folded, tile=128)
    prob = jax.block_until_ready(prob)

    ref = _reference(h_lnc, h_mi, h_mr, h_dis, params)
    assert prob.shape == (batch, 1)
    assert jnp.allclose(prob, ref, atol=1e-4, rtol=1e-4), "mismatch vs reference"

    print("KERNEL_OK")
</pallas_src>

<mosaic_0001>
module attributes {stable_mosaic.version = 11 : i64} {
  func.func @_classifier_kernel(%arg0: i32, %arg1: memref<128x128xf32, #tpu.memory_space<vmem>>, %arg2: memref<128x256xf32, #tpu.memory_space<vmem>>, %arg3: memref<1x256xf32, #tpu.memory_space<vmem>>, %arg4: memref<128x128xf32, #tpu.memory_space<vmem>>, %arg5: memref<1x128xf32, #tpu.memory_space<vmem>>, %arg6: memref<1x1xf32, #tpu.memory_space<vmem>>, %arg7: memref<128x1xf32, #tpu.memory_space<vmem>>) attributes {dimension_semantics = [#tpu.dimension_semantics<parallel>], iteration_bounds = array<i64: 3>, scalar_prefetch = 0 : i64, scratch_operands = 0 : i64, tpu.core_type = #tpu.core_type<tc>, window_params = [{transform_indices = @transform_0, window_bounds = array<i64: 128, 128>}, {pipeline_mode = #tpu.pipeline_mode<synchronous>, transform_indices = @transform_1, window_bounds = array<i64: 128, 256>}, {pipeline_mode = #tpu.pipeline_mode<synchronous>, transform_indices = @transform_2, window_bounds = array<i64: 1, 256>}, {pipeline_mode = #tpu.pipeline_mode<synchronous>, transform_indices = @transform_3, window_bounds = array<i64: 128, 128>}, {pipeline_mode = #tpu.pipeline_mode<synchronous>, transform_indices = @transform_4, window_bounds = array<i64: 1, 128>}, {pipeline_mode = #tpu.pipeline_mode<synchronous>, transform_indices = @transform_5, window_bounds = array<i64: 1, 1>}, {transform_indices = @transform_6, window_bounds = array<i64: 128, 1>}]} {
    %c0 = arith.constant 0 : index
    %c0_0 = arith.constant 0 : index
    %0 = vector.load %arg1[%c0, %c0_0] : memref<128x128xf32, #tpu.memory_space<vmem>>, vector<128x128xf32>
    %c0_1 = arith.constant 0 : index
    %c0_2 = arith.constant 0 : index
    %1 = vector.load %arg2[%c0_1, %c0_2] : memref<128x256xf32, #tpu.memory_space<vmem>>, vector<128x256xf32>
    %cst = arith.constant dense<0.000000e+00> : vector<128x256xf32>
    %2 = tpu.matmul %0, %1, %cst {dimension_numbers = #tpu.dot_dimension_numbers<[1], [0], [0], [1], [0, 0, 1, 1], [], []>} : vector<128x128xf32>, vector<128x256xf32>, vector<128x256xf32> -> vector<128x256xf32>
    %c0_3 = arith.constant 0 : index
    %c0_4 = arith.constant 0 : index
    %3 = vector.load %arg3[%c0_3, %c0_4] : memref<1x256xf32, #tpu.memory_space<vmem>>, vector<1x256xf32>
    %4 = vector.broadcast %3 : vector<1x256xf32> to vector<128x256xf32>
    %5 = arith.addf %2, %4 : vector<128x256xf32>
    %6 = vector.extract_strided_slice %5 {offsets = [0, 0], sizes = [128, 128], strides = [1, 1]} : vector<128x256xf32> to vector<128x128xf32>
    %cst_5 = arith.constant 0.000000e+00 : f32
    %7 = vector.broadcast %cst_5 : f32 to vector<128x128xf32>
    %8 = arith.maximumf %6, %7 : vector<128x128xf32>
    %c0_6 = arith.constant 0 : index
    %c0_7 = arith.constant 0 : index
    %9 = vector.load %arg4[%c0_6, %c0_7] : memref<128x128xf32, #tpu.memory_space<vmem>>, vector<128x128xf32>
    %cst_8 = arith.constant dense<0.000000e+00> : vector<128x128xf32>
    %10 = tpu.matmul %8, %9, %cst_8 {dimension_numbers = #tpu.dot_dimension_numbers<[1], [0], [0], [1], [0, 0, 1, 1], [], []>} : vector<128x128xf32>, vector<128x128xf32>, vector<128x128xf32> -> vector<128x128xf32>
    %11 = vector.extract_strided_slice %5 {offsets = [0, 128], sizes = [128, 128], strides = [1, 1]} : vector<128x256xf32> to vector<128x128xf32>
    %12 = arith.addf %10, %11 : vector<128x128xf32>
    %cst_9 = arith.constant 0.000000e+00 : f32
    %13 = vector.broadcast %cst_9 : f32 to vector<128x128xf32>
    %14 = arith.maximumf %12, %13 : vector<128x128xf32>
    %c0_10 = arith.constant 0 : index
    %c0_11 = arith.constant 0 : index
    %15 = vector.load %arg5[%c0_10, %c0_11] : memref<1x128xf32, #tpu.memory_space<vmem>>, vector<1x128xf32>
    %16 = vector.broadcast %15 : vector<1x128xf32> to vector<128x128xf32>
    %17 = arith.mulf %14, %16 : vector<128x128xf32>
    %cst_12 = arith.constant dense<0.000000e+00> : vector<128xf32>
    %18 = vector.multi_reduction <add>, %17, %cst_12 [1] : vector<128x128xf32> to vector<128xf32>
    %19 = vector.shape_cast %18 : vector<128xf32> to vector<128x1xf32>
    %c0_13 = arith.constant 0 : index
    %c0_14 = arith.constant 0 : index
    %20 = vector.load %arg6[%c0_13, %c0_14] : memref<1x1xf32, #tpu.memory_space<vmem>>, vector<1x1xf32>
    %21 = vector.broadcast %20 : vector<1x1xf32> to vector<128x1xf32>
    %22 = arith.addf %19, %21 : vector<128x1xf32>
    %23 = arith.negf %22 : vector<128x1xf32>
    %24 = math.exp %23 : vector<128x1xf32>
    %cst_15 = arith.constant 1.000000e+00 : f32
    %25 = vector.broadcast %cst_15 : f32 to vector<128x1xf32>
    %26 = arith.addf %25, %24 : vector<128x1xf32>
    %27 = arith.divf %25, %26 : vector<128x1xf32>
    %c0_16 = arith.constant 0 : index
    %c0_17 = arith.constant 0 : index
    %28 = vector.load %arg7[%c0_16, %c0_17] : memref<128x1xf32, #tpu.memory_space<vmem>>, vector<128x1xf32>
    tpu.vector_store %arg7[%c0_16, %c0_17], %27 {strides = array<i32>} : memref<128x1xf32, #tpu.memory_space<vmem>>, vector<128x1xf32>,
    return
  }
  func.func @transform_0(%arg0: i32) -> (i32, i32) {
    %c0_i32 = arith.constant 0 : i32
    %c0_i32_0 = arith.constant 0 : i32
    return %arg0, %c0_i32 : i32, i32
  }
  func.func @transform_1(%arg0: i32) -> (i32, i32) {
    %c0_i32 = arith.constant 0 : i32
    %c0_i32_0 = arith.constant 0 : i32
    %c0_i32_1 = arith.constant 0 : i32
    return %c0_i32, %c0_i32_0 : i32, i32
  }
  func.func @transform_2(%arg0: i32) -> (i32, i32) {
    %c0_i32 = arith.constant 0 : i32
    %c0_i32_0 = arith.constant 0 : i32
    %c0_i32_1 = arith.constant 0 : i32
    return %c0_i32, %c0_i32_0 : i32, i32
  }
  func.func @transform_3(%arg0: i32) -> (i32, i32) {
    %c0_i32 = arith.constant 0 : i32
    %c0_i32_0 = arith.constant 0 : i32
    %c0_i32_1 = arith.constant 0 : i32
    return %c0_i32, %c0_i32_0 : i32, i32
  }
  func.func @transform_4(%arg0: i32) -> (i32, i32) {
    %c0_i32 = arith.constant 0 : i32
    %c0_i32_0 = arith.constant 0 : i32
    %c0_i32_1 = arith.constant 0 : i32
    return %c0_i32, %c0_i32_0 : i32, i32
  }
  func.func @transform_5(%arg0: i32) -> (i32, i32) {
    %c0_i32 = arith.constant 0 : i32
    %c0_i32_0 = arith.constant 0 : i32
    %c0_i32_1 = arith.constant 0 : i32
    return %c0_i32, %c0_i32_0 : i32, i32
  }
  func.func @transform_6(%arg0: i32) -> (i32, i32) {
    %c0_i32 = arith.constant 0 : i32
    %c0_i32_0 = arith.constant 0 : i32
    return %arg0, %c0_i32 : i32, i32
  }
}

</mosaic_0001>

<bundles_post_ra>
// kernel: rna_disease_classifier.1
= control target key start
LH: loop header
LB: loop body
LE: loop exit
PB: predicated region body
PF: predicated region fallthrough
CT: control target
= control target key end

     0   :  { %s1198_s23 = smov 0   ;;  %s1580_s0 = inlined_call_operand.vmem [shape: f32[384,128], index: 0, kind: input, shape index: {}]   ;;  %s1581_s1 = inlined_call_operand.vmem [shape: f32[128,256], index: 1, kind: input, shape index: {}]   ;;  %s1582_s2 = inlined_call_operand.vmem [shape: f32[1,256], index: 2, kind: input, shape index: {}]   ;;  %s1583_s3 = inlined_call_operand.vmem [shape: f32[128,128], index: 3, kind: input, shape index: {}]   ;;  %s1584_s4 = inlined_call_operand.vmem [shape: f32[1,128], index: 4, kind: input, shape index: {}]   ;;  %s1585_s5 = inlined_call_operand.<no memory space> [shape: f32[1,1], index: 5, kind: input, shape index: {}]   ;;  %s1586_s6 = inlined_call_operand.vmem [shape: f32[384,1], index: 6, kind: output, shape index: {}]  }
   0x1   :  { %v11_v0 = vstv %s1585_s5 }
   0x2   :  { %12 = vst [vmem:[#allocation2] sm:$0x1] %v11_v0 }
   0x3 LB: > { %s1003_s24 = sadd.s32 4294967295, %s1158_s23   ;;  %p1007_p0 = scmp.ge.s32.totalorder %s1158_s23, 1  ;;  %s1158_s23 = sphi %s1198_s23, %s18_s23  }
   0x4   : > { %p215_p1 = scmp.lt.s32.totalorder %s1158_s23, 4 }
   0x6   : > { %p216_p2 = pnand %p1007_p0, %p215_p1 }
   0x7   : > { %s1008_s16 = sshll.u32 (!%p216_p2), %s1003_s24, 4 }
   0x8   : > { %219 = sbr.rel (%p216_p2) target bundleno = 558 (0x22e), region = 44  ;;  %p246_p3 = scmp.lt.s32.totalorder (!%p216_p2), %s1008_s16, 47 }
   0xd   : > { %v303_v1 = vld [vmem:[%s1581_s1 + $0xf0] sm:$0xff]  ;;  %v301_v2 = vld [vmem:[%s1581_s1 + $0xe0] sm:$0xff]  ;;  %s1588_s16 = smov (!%p246_p3, %s1008_s16), 47  ;;  %v304_v27 = vld [vmem:[%s1581_s1 + $0xf8] sm:$0xff]  ;;  %vm930_vm2 = vcmask 7168  }
   0xe   : > { %311 = vmatpush.msra.mxu0 %v303_v1  ;;  %1030 = vmatpush.msra.mxu3 %v303_v1  ;;  %v299_v3 = vld [vmem:[%s1581_s1 + $0xd0] sm:$0xff]  ;;  %v297_v4 = vld [vmem:[%s1581_s1 + $0xc0] sm:$0xff]  ;;  %s1009_s27 = sshll.u32 %s1588_s16, 3  ;;  %v302_v28 = vld [vmem:[%s1581_s1 + $0xe8] sm:$0xff] }
   0xf   : > { %v295_v5 = vld [vmem:[%s1581_s1 + $0xb0] sm:$0xff]  ;;  %v293_v6 = vld [vmem:[%s1581_s1 + $0xa0] sm:$0xff]  ;;  %s1259_s10 = scalar_lea.vmem %s1580_s0, %s1009_s27  ;;  %376 = vmatpush.msra.mxu1 %v304_v27  ;;  %v300_v29 = vld [vmem:[%s1581_s1 + $0xd8] sm:$0xff]  ;;  %s1525_s20 = scalar_lea.vmem %s1586_s6, %s1009_s27 }
  0x10   : > { %312 = vmatpush.msra.mxu0 %v301_v2  ;;  %1031 = vmatpush.msra.mxu3 %v301_v2  ;;  %v291_v7 = vld [vmem:[%s1581_s1 + $0x90] sm:$0xff]  ;;  %v289_v8 = vld [vmem:[%s1581_s1 + $0x80] sm:$0xff]  ;;  %v1273_v19 = vld [vmem:[%s1259_s10 + $0x8] sm:$0xff] }
  0x11   : > { %v287_v9 = vld [vmem:[%s1581_s1 + $0x70] sm:$0xff]  ;;  %v285_v10 = vld [vmem:[%s1581_s1 + $0x60] sm:$0xff]  ;;  %v1276_v20 = vld [vmem:[%s1259_s10 + $0x68] sm:$0xff]  ;;  %377 = vmatpush.msra.mxu1 %v302_v28 }
  0x12   : > { %313 = vmatpush.msra.mxu0 %v299_v3  ;;  %1032 = vmatpush.msra.mxu3 %v299_v3  ;;  %v283_v11 = vld [vmem:[%s1581_s1 + $0x50] sm:$0xff]  ;;  %v281_v12 = vld [vmem:[%s1581_s1 + $0x40] sm:$0xff]  ;;  %v1289_v23 = vld [vmem:[%s1259_s10 + $0x18] sm:$0xff] }
  0x13   : > { %v279_v13 = vld [vmem:[%s1581_s1 + $0x30] sm:$0xff]  ;;  %v277_v14 = vld [vmem:[%s1581_s1 + $0x20] sm:$0xff]  ;;  %v1292_v24 = vld [vmem:[%s1259_s10 + $0x78] sm:$0xff]  ;;  %378 = vmatpush.msra.mxu1 %v300_v29 }
  0x14   : > { %314 = vmatpush.msra.mxu0 %v297_v4  ;;  %1033 = vmatpush.msra.mxu3 %v297_v4  ;;  %v275_v15 = vld [vmem:[%s1581_s1 + $0x10] sm:$0xff]  ;;  %v273_v16 = vld [vmem:[%s1581_s1] sm:$0xff]  ;;  %v1301_v26 = vld [vmem:[%s1259_s10 + $0x28] sm:$0xff] }
  0x15   : > { %v1265_v17 = vld [vmem:[%s1259_s10] sm:$0xff]  ;;  %v1281_v21 = vld [vmem:[%s1259_s10 + $0x10] sm:$0xff]  ;;  %v298_v31 = vld [vmem:[%s1581_s1 + $0xc8] sm:$0xff] }
  0x16   : > { %315 = vmatpush.msra.mxu0 %v295_v5  ;;  %1034 = vmatpush.msra.mxu3 %v295_v5  ;;  %v1268_v18 = vld [vmem:[%s1259_s10 + $0x60] sm:$0xff]  ;;  %v1284_v22 = vld [vmem:[%s1259_s10 + $0x70] sm:$0xff]  ;;  %v296_v32 = vld [vmem:[%s1581_s1 + $0xb8] sm:$0xff] }
  0x17   : > { %v1297_v25 = vld [vmem:[%s1259_s10 + $0x20] sm:$0xff]  ;;  %v1314_v30 = vld [vmem:[%s1259_s10 + $0x30] sm:$0xff]  ;;  %379 = vmatpush.msra.mxu1 %v298_v31  ;;  %v294_v33 = vld [vmem:[%s1581_s1 + $0xa8] sm:$0xff] }
  0x18   : > { %316 = vmatpush.msra.mxu0 %v293_v6  ;;  %1035 = vmatpush.msra.mxu3 %v293_v6  ;;  %v292_v34 = vld [vmem:[%s1581_s1 + $0x98] sm:$0xff]  ;;  %v290_v36 = vld [vmem:[%s1581_s1 + $0x88] sm:$0xff]  ;;  %v471_v40 = vld [vmem:[%s1583_s3 + $0x70] sm:$0xff] }
  0x19   : > { %380 = vmatpush.msra.mxu1 %v296_v32  ;;  %v1330_v35 = vld [vmem:[%s1259_s10 + $0x38] sm:$0xff]  ;;  %v286_v38 = vld [vmem:[%s1581_s1 + $0x68] sm:$0xff]  ;;  %v1355_v43 = vld [vmem:[%s1259_s10 + $0x40] sm:$0xff] }
  0x1a   : > { %317 = vmatpush.msra.mxu0 %v291_v7  ;;  %1036 = vmatpush.msra.mxu3 %v291_v7  ;;  %v288_v37 = vld [vmem:[%s1581_s1 + $0x78] sm:$0xff]  ;;  %v470_v42 = vld [vmem:[%s1583_s3 + $0x68] sm:$0xff]  ;;  %v469_v45 = vld [vmem:[%s1583_s3 + $0x60] sm:$0xff] }
  0x1b   : > { %381 = vmatpush.msra.mxu1 %v294_v33  ;;  %v472_v39 = vld [vmem:[%s1583_s3 + $0x78] sm:$0xff]  ;;  %v282_v44 = vld [vmem:[%s1581_s1 + $0x48] sm:$0xff]  ;;  %v467_v49 = vld [vmem:[%s1583_s3 + $0x50] sm:$0xff] }
  0x1c   : > { %318 = vmatpush.msra.mxu0 %v289_v8  ;;  %1037 = vmatpush.msra.mxu3 %v289_v8  ;;  %v284_v41 = vld [vmem:[%s1581_s1 + $0x58] sm:$0xff]  ;;  %v278_v48 = vld [vmem:[%s1581_s1 + $0x28] sm:$0xff]  ;;  %v465_v54 = vld [vmem:[%s1583_s3 + $0x40] sm:$0xff] }
  0x1d   : > { %382 = vmatpush.msra.mxu1 %v292_v34  ;;  %473 = vmatpush.msra.mxu2 %v472_v39  ;;  %v280_v46 = vld [vmem:[%s1581_s1 + $0x38] sm:$0xff]  ;;  %v466_v51 = vld [vmem:[%s1583_s3 + $0x48] sm:$0xff]  ;;  %v463_v56 = vld [vmem:[%s1583_s3 + $0x30] sm:$0xff] }
  0x1e   : > { %319 = vmatpush.msra.mxu0 %v287_v9  ;;  %1038 = vmatpush.msra.mxu3 %v287_v9  ;;  %v468_v47 = vld [vmem:[%s1583_s3 + $0x58] sm:$0xff]  ;;  %v1383_v52 = vld [vmem:[%s1259_s10 + $0x48] sm:$0xff]  ;;  %v1404_v58 = vld [vmem:[%s1259_s10 + $0x50] sm:$0xff] }
  0x1f   : > { %383 = vmatpush.msra.mxu1 %v290_v36  ;;  %474 = vmatpush.msra.mxu2 %v471_v40  ;;  %v276_v50 = vld [vmem:[%s1581_s1 + $0x18] sm:$0xff]  ;;  %v274_v53 = vld [vmem:[%s1581_s1 + $0x8] sm:$0xff]  ;;  %v461_v59 = vld [vmem:[%s1583_s3 + $0x20] sm:$0xff] }
  0x20   : > { %320 = vmatpush.msra.mxu0 %v285_v10  ;;  %1039 = vmatpush.msra.mxu3 %v285_v10  ;;  %v464_v55 = vld [vmem:[%s1583_s3 + $0x38] sm:$0xff]  ;;  %v462_v57 = vld [vmem:[%s1583_s3 + $0x28] sm:$0xff]  ;;  %v459_v62 = vld [vmem:[%s1583_s3 + $0x10] sm:$0xff] }
  0x21   : > { %384 = vmatpush.msra.mxu1 %v288_v37  ;;  %475 = vmatpush.msra.mxu2 %v470_v42  ;;  %v460_v60 = vld [vmem:[%s1583_s3 + $0x18] sm:$0xff]  ;;  %v458_v63 = vld [vmem:[%s1583_s3 + $0x8] sm:$0xff]  ;;  %v457_v0 = vld [vmem:[%s1583_s3] sm:$0xff] }
  0x22   : > { %321 = vmatpush.msra.mxu0 %v283_v11  ;;  %1040 = vmatpush.msra.mxu3 %v283_v11  ;;  %v1416_v61 = vld [vmem:[%s1259_s10 + $0x58] sm:$0xff]  ;;  %v1437_v1 = vld [vmem:[%s1582_s2] sm:$0x3] }
  0x23   : > { %385 = vmatpush.msra.mxu1 %v286_v38  ;;  %476 = vmatpush.msra.mxu2 %v469_v45  ;;  %v1440_v2 = vperm.slane %v1437_v1, 0 }
  0x24   : > { %322 = vmatpush.msra.mxu0 %v281_v12  ;;  %1041 = vmatpush.msra.mxu3 %v281_v12 }
  0x25   : > { %386 = vmatpush.msra.mxu1 %v284_v41  ;;  %477 = vmatpush.msra.mxu2 %v468_v47 }
  0x26   : > { %323 = vmatpush.msra.mxu0 %v279_v13  ;;  %1042 = vmatpush.msra.mxu3 %v279_v13 }
  0x27   : > { %387 = vmatpush.msra.mxu1 %v282_v44  ;;  %478 = vmatpush.msra.mxu2 %v467_v49 }
  0x28   : > { %324 = vmatpush.msra.mxu0 %v277_v14  ;;  %1043 = vmatpush.msra.mxu3 %v277_v14 }
  0x29   : > { %388 = vmatpush.msra.mxu1 %v280_v46  ;;  %479 = vmatpush.msra.mxu2 %v466_v51 }
  0x2a   : > { %325 = vmatpush.msra.mxu0 %v275_v15  ;;  %1044 = vmatpush.msra.mxu3 %v275_v15 }
  0x2b   : > { %389 = vmatpush.msra.mxu1 %v278_v48  ;;  %480 = vmatpush.msra.mxu2 %v465_v54 }
  0x2c   : > { %326 = vmatpush.msra.mxu0 %v273_v16  ;;  %1045 = vmatpush.msra.mxu3 %v273_v16 }
  0x2d   : > { %327 = vmatmul.f32.vlgmr.msra.gmra.mxu0 %v1265_v17  ;;  %363 = vmatmul.f32.vlgmr.msra.gmra.mxu3 %v1268_v18 }
  0x2e   : > { %1046 = vmatpush.msrb.mxu3 %v304_v27  ;;  %390 = vmatpush.msra.mxu1 %v276_v50 }
  0x2f   : > { %481 = vmatpush.msra.mxu2 %v464_v55 }
  0x30   : > { %1047 = vmatpush.msrb.mxu3 %v302_v28  ;;  %391 = vmatpush.msra.mxu1 %v274_v53 }
  0x31   : > { %392 = vmatmul.f32.vlgmr.msra.gmra.mxu1 %v1265_v17  ;;  %482 = vmatpush.msra.mxu2 %v463_v56 }
  0x32   : > { %1048 = vmatpush.msrb.mxu3 %v300_v29 }
  0x33   : > { %483 = vmatpush.msra.mxu2 %v462_v57 }
  0x34   : > { %1049 = vmatpush.msrb.mxu3 %v298_v31 }
  0x35   : > { %330 = vmatmul.f32.gmra.mxu0 %v1273_v19  ;;  %366 = vmatmul.f32.gmra.mxu3 %v1276_v20 }
  0x36   : > { %1050 = vmatpush.msrb.mxu3 %v296_v32  ;;  %484 = vmatpush.msra.mxu2 %v461_v59 }
  0x38   : > { %1051 = vmatpush.msrb.mxu3 %v294_v33  ;;  %485 = vmatpush.msra.mxu2 %v460_v60 }
  0x39   : > { %395 = vmatmul.f32.gmra.mxu1 %v1273_v19 }
  0x3a   : > { %1052 = vmatpush.msrb.mxu3 %v292_v34  ;;  %486 = vmatpush.msra.mxu2 %v459_v62 }
  0x3c   : > { %1053 = vmatpush.msrb.mxu3 %v290_v36  ;;  %487 = vmatpush.msra.mxu2 %v458_v63 }
  0x3d   : > { %333 = vmatmul.f32.gmra.mxu0 %v1281_v21  ;;  %369 = vmatmul.f32.gmra.mxu3 %v1284_v22 }
  0x3e   : > { %1054 = vmatpush.msrb.mxu3 %v288_v37  ;;  %488 = vmatpush.msra.mxu2 %v457_v0 }
  0x40   : > { %1055 = vmatpush.msrb.mxu3 %v286_v38 }
  0x41   : > { %398 = vmatmul.f32.gmra.mxu1 %v1281_v21 }
  0x42   : > { %1056 = vmatpush.msrb.mxu3 %v284_v41 }
  0x44   : > { %1057 = vmatpush.msrb.mxu3 %v282_v44 }
  0x45   : > { %336 = vmatmul.f32.gmra.mxu0 %v1289_v23  ;;  %372 = vmatmul.f32.gmra.mxu3 %v1292_v24 }
  0x46   : > { %1058 = vmatpush.msrb.mxu3 %v280_v46 }
  0x48   : > { %1059 = vmatpush.msrb.mxu3 %v278_v48 }
  0x49   : > { %401 = vmatmul.f32.gmra.mxu1 %v1289_v23 }
  0x4a   : > { %1060 = vmatpush.msrb.mxu3 %v276_v50 }
  0x4c   : > { %1061 = vmatpush.msrb.mxu3 %v274_v53 }
  0x4d   : > { %339 = vmatmul.f32.gmra.mxu0 %v1297_v25  ;;  %428 = vmatmul.f32.vlgmr.msrb.gmra.mxu3 %v1268_v18 }
  0x4e   : > { %1062 = vmatpush.msra.mxu3 %v472_v39 }
  0x50   : > { %1063 = vmatpush.msra.mxu3 %v471_v40 }
  0x51   : > { %404 = vmatmul.f32.gmra.mxu1 %v1297_v25 }
  0x52   : > { %1064 = vmatpush.msra.mxu3 %v470_v42 }
  0x54   : > { %1065 = vmatpush.msra.mxu3 %v469_v45 }
  0x55   : > { %342 = vmatmul.f32.gmra.mxu0 %v1301_v26  ;;  %431 = vmatmul.f32.gmra.mxu3 %v1276_v20 }
  0x56   : > { %1066 = vmatpush.msra.mxu3 %v468_v47 }
  0x58   : > { %1067 = vmatpush.msra.mxu3 %v467_v49 }
  0x59   : > { %407 = vmatmul.f32.gmra.mxu1 %v1301_v26 }
  0x5a   : > { %1068 = vmatpush.msra.mxu3 %v466_v51 }
  0x5c   : > { %1069 = vmatpush.msra.mxu3 %v465_v54 }
  0x5d   : > { %345 = vmatmul.f32.gmra.mxu0 %v1314_v30  ;;  %434 = vmatmul.f32.gmra.mxu3 %v1284_v22 }
  0x5e   : > { %1070 = vmatpush.msra.mxu3 %v464_v55 }
  0x60   : > { %1071 = vmatpush.msra.mxu3 %v463_v56 }
  0x61   : > { %410 = vmatmul.f32.gmra.mxu1 %v1314_v30 }
  0x62   : > { %1072 = vmatpush.msra.mxu3 %v462_v57  ;;  %v1469_v57 = vperm.slane %v1437_v1, 1 }
  0x64   : > { %1073 = vmatpush.msra.mxu3 %v461_v59 }
  0x65   : > { %348 = vmatmul.f32.gmra.mxu0 %v1330_v35  ;;  %437 = vmatmul.f32.gmra.mxu3 %v1292_v24 }
  0x66   : > { %1074 = vmatpush.msra.mxu3 %v460_v60 }
  0x68   : > { %1075 = vmatpush.msra.mxu3 %v459_v62  ;;  %v1477_v62 = vld [vmem:[%s1584_s4] ss:$0 sm:$0xff] }
  0x69   : > { %413 = vmatmul.f32.gmra.mxu1 %v1330_v35 }
  0x6a   : > { %1076 = vmatpush.msra.mxu3 %v458_v63 }
  0x6c   : > { %1077 = vmatpush.msra.mxu3 %v457_v0 }
  0x6d   : > { %351 = vmatmul.f32.gmra.mxu0 %v1355_v43 }
  0x71   : > { %416 = vmatmul.f32.gmra.mxu1 %v1355_v43 }
  0x75   : > { %354 = vmatmul.f32.gmra.mxu0 %v1383_v52 }
  0x79   : > { %419 = vmatmul.f32.gmra.mxu1 %v1383_v52 }
  0x7d   : > { %357 = vmatmul.f32.gmra.mxu0 %v1404_v58 }
  0x81   : > { %422 = vmatmul.f32.gmra.mxu1 %v1404_v58 }
  0x85   : > { %360 = vmatmul.f32.gmra.mxu0 %v1416_v61 }
  0x89   : > { %425 = vmatmul.f32.gmra.mxu1 %v1416_v61 }
  0xaa   : > { %v328_v3 = vpop.f32.mrf.mxu0 }
  0xab   : > { %v329_v4 = vadd.f32 %v328_v3, %v1440_v2 }
  0xad   : > { %v441_v5 = vmax.f32 %v329_v4, 0.0 }
  0xae   : > { %v393_v52 = vpop.f32.mrf.mxu1 }
  0xaf   : > { %489 = vmatmul.f32.vlgmr.msra.gmra.mxu2 %v441_v5  ;;  %v394_v59 = vadd.f32 %v393_v52, %v1469_v57 }
  0xb0   : > { %v364_v6 = vpop.f32.mrf.mxu3 }
  0xb1   : > { %v365_v7 = vadd.f32 %v364_v6, %v1440_v2 }
  0xb2   : > { %v331_v8 = vpop.f32.mrf.mxu0 }
  0xb3   : > { %v332_v9 = vadd.f32 %v331_v8, %v1440_v2  ;;  %v453_v10 = vmax.f32 %v365_v7, 0.0 }
  0xb5   : > { %v442_v11 = vmax.f32 %v332_v9, 0.0  ;;  %525 = vmatmul.f32.vlgmr.msra.gmra.mxu3 %v453_v10 }
  0xb6   : > { %v396_v54 = vpop.f32.mrf.mxu1 }
  0xb7   : > { %492 = vmatmul.f32.gmra.mxu2 %v442_v11  ;;  %v397_v6 = vadd.f32 %v396_v54, %v1469_v57 }
  0xb8   : > { %v367_v12 = vpop.f32.mrf.mxu3 }
  0xb9   : > { %v368_v13 = vadd.f32 %v367_v12, %v1440_v2 }
  0xba   : > { %v334_v14 = vpop.f32.mrf.mxu0 }
  0xbb   : > { %v335_v15 = vadd.f32 %v334_v14, %v1440_v2  ;;  %v454_v16 = vmax.f32 %v368_v13, 0.0 }
  0xbd   : > { %v443_v17 = vmax.f32 %v335_v15, 0.0  ;;  %528 = vmatmul.f32.gmra.mxu3 %v454_v16 }
  0xbe   : > { %v399_v56 = vpop.f32.mrf.mxu1 }
  0xbf   : > { %495 = vmatmul.f32.gmra.mxu2 %v443_v17  ;;  %v400_v11 = vadd.f32 %v399_v56, %v1469_v57 }
  0xc0   : > { %v370_v18 = vpop.f32.mrf.mxu3 }
  0xc1   : > { %v371_v19 = vadd.f32 %v370_v18, %v1440_v2 }
  0xc2   : > { %v337_v20 = vpop.f32.mrf.mxu0 }
  0xc3   : > { %v338_v21 = vadd.f32 %v337_v20, %v1440_v2  ;;  %v455_v22 = vmax.f32 %v371_v19, 0.0 }
  0xc5   : > { %v444_v23 = vmax.f32 %v338_v21, 0.0  ;;  %531 = vmatmul.f32.gmra.mxu3 %v455_v22 }
  0xc6   : > { %v402_v63 = vpop.f32.mrf.mxu1 }
  0xc7   : > { %498 = vmatmul.f32.gmra.mxu2 %v444_v23  ;;  %v403_v16 = vadd.f32 %v402_v63, %v1469_v57 }
  0xc8   : > { %v373_v24 = vpop.f32.mrf.mxu3 }
  0xc9   : > { %v374_v25 = vadd.f32 %v373_v24, %v1440_v2 }
  0xca   : > { %v340_v26 = vpop.f32.mrf.mxu0 }
  0xcb   : > { %v341_v27 = vadd.f32 %v340_v26, %v1440_v2  ;;  %v456_v28 = vmax.f32 %v374_v25, 0.0 }
  0xcd   : > { %v445_v29 = vmax.f32 %v341_v27, 0.0  ;;  %534 = vmatmul.f32.gmra.mxu3 %v456_v28 }
  0xce   : > { %v405_v9 = vpop.f32.mrf.mxu1 }
  0xcf   : > { %501 = vmatmul.f32.gmra.mxu2 %v445_v29  ;;  %v406_v23 = vadd.f32 %v405_v9, %v1469_v57 }
  0xd0   : > { %v429_v51 = vpop.f32.mrf.mxu3 }
  0xd1   : > { %v430_v0 = vadd.f32 %v429_v51, %v1469_v57 }
  0xd2   : > { %v343_v30 = vpop.f32.mrf.mxu0 }
  0xd3   : > { %v344_v31 = vadd.f32 %v343_v30, %v1440_v2 }
  0xd5   : > { %v446_v32 = vmax.f32 %v344_v31, 0.0 }
  0xd6   : > { %v408_v19 = vpop.f32.mrf.mxu1 }
  0xd7   : > { %504 = vmatmul.f32.gmra.mxu2 %v446_v32  ;;  %v409_v29 = vadd.f32 %v408_v19, %v1469_v57 }
  0xd8   : > { %v1464_v53 = vpop.f32.mrf.mxu3 }
  0xda   : > { %v346_v33 = vpop.f32.mrf.mxu0 }
  0xdb   : > { %v347_v34 = vadd.f32 %v346_v33, %v1440_v2 }
  0xdd   : > { %v447_v35 = vmax.f32 %v347_v34, 0.0 }
  0xde   : > { %v411_v26 = vpop.f32.mrf.mxu1 }
  0xdf   : > { %507 = vmatmul.f32.gmra.mxu2 %v447_v35  ;;  %v412_v35 = vadd.f32 %v411_v26, %v1469_v57 }
  0xe0   : > { %v1466_v55 = vpop.f32.mrf.mxu3 }
  0xe2   : > { %v349_v36 = vpop.f32.mrf.mxu0 }
  0xe3   : > { %v350_v37 = vadd.f32 %v349_v36, %v1440_v2 }
  0xe5   : > { %v448_v38 = vmax.f32 %v350_v37, 0.0 }
  0xe6   : > { %v414_v33 = vpop.f32.mrf.mxu1 }
  0xe7   : > { %510 = vmatmul.f32.gmra.mxu2 %v448_v38 }
  0xe8   : > { %v1471_v58 = vpop.f32.mrf.mxu3 }
  0xe9   : > { %v439_v63 = vadd.f32 %v1471_v58, %v1469_v57 }
  0xea   : > { %v352_v39 = vpop.f32.mrf.mxu0 }
  0xeb   : > { %v353_v40 = vadd.f32 %v352_v39, %v1440_v2 }
  0xed   : > { %v449_v41 = vmax.f32 %v353_v40, 0.0 }
  0xee   : > { %v417_v40 = vpop.f32.mrf.mxu1 }
  0xef   : > { %513 = vmatmul.f32.gmra.mxu2 %v449_v41  ;;  %v415_v41 = vadd.f32 %v414_v33, %v1469_v57 }
  0xf2   : > { %v355_v42 = vpop.f32.mrf.mxu0 }
  0xf3   : > { %v356_v43 = vadd.f32 %v355_v42, %v1440_v2 }
  0xf5   : > { %v450_v44 = vmax.f32 %v356_v43, 0.0 }
  0xf7   : > { %516 = vmatmul.f32.gmra.mxu2 %v450_v44 }
  0xfa   : > { %v358_v45 = vpop.f32.mrf.mxu0 }
  0xfb   : > { %v359_v46 = vadd.f32 %v358_v45, %v1440_v2 }
  0xfd   : > { %v451_v47 = vmax.f32 %v359_v46, 0.0 }
  0xff   : > { %519 = vmatmul.f32.gmra.mxu2 %v451_v47  ;;  %v418_v47 = vadd.f32 %v417_v40, %v1469_v57 }
 0x102   : > { %v361_v48 = vpop.f32.mrf.mxu0 }
 0x103   : > { %v362_v49 = vadd.f32 %v361_v48, %v1440_v2 }
 0x105   : > { %v452_v50 = vmax.f32 %v362_v49, 0.0  ;;  %v420_v49 = vpop.f32.mrf.mxu1 }
 0x106   : > { %v421_v56 = vadd.f32 %v420_v49, %v1469_v57 }
 0x107   : > { %522 = vmatmul.f32.gmra.mxu2 %v452_v50 }
 0x132   : > { %v490_v60 = vpop.f32.mrf.mxu2 }
 0x133   : > { %v491_v61 = vadd.f32 %v490_v60, %v394_v59 }
 0x135   : > { %v538_v2 = vmax.f32 %v491_v61, 0.0  ;;  %v423_v61 = vpop.f32.mrf.mxu1 }
 0x137   : > { %v558_v3 = vmul.f32 %v1477_v62, %v538_v2 }
 0x138   : > { %v526_v4 = vpop.f32.mrf.mxu3 }
 0x139   : > { %574 = vadd.xlane.f32.xlu0 %v558_v3  ;;  %v527_v1 = vadd.f32 %v526_v4, %v430_v0 }
 0x13a   : > { %v493_v5 = vpop.f32.mrf.mxu2 }
 0x13b   : > { %v550_v7 = vmax.f32 %v527_v1, 0.0  ;;  %v494_v10 = vadd.f32 %v493_v5, %v397_v6  ;;  %v424_v1 = vadd.f32 %v423_v61, %v1469_v57 }
 0x13d   : > { %v570_v8 = vmul.f32 %v1477_v62, %v550_v7  ;;  %v539_v13 = vmax.f32 %v494_v10, 0.0  ;;  %v433_v7 = vadd.f32 %v1464_v53, %v1469_v57  ;;  %v426_v10 = vpop.f32.mrf.mxu1 }
 0x13e   : > { %v427_v58 = vadd.f32 %v426_v10, %v1469_v57 }
 0x13f   : > { %v559_v18 = vmul.f32 %v1477_v62, %v539_v13 }
 0x140   : > { %v529_v43 = vpop.f32.mrf.mxu3 }
 0x141   : > { %598 = vadd.xlane.f32.xlu0 %v570_v8 }
 0x142   : > { %v496_v12 = vpop.f32.mrf.mxu2 }
 0x143   : > { %v497_v14 = vadd.f32 %v496_v12, %v400_v11  ;;  %v530_v12 = vadd.f32 %v529_v43, %v433_v7 }
 0x145   : > { %v540_v15 = vmax.f32 %v497_v14, 0.0 }
 0x147   : > { %v560_v17 = vmul.f32 %v1477_v62, %v540_v15 }
 0x148   : > { %v532_v50 = vpop.f32.mrf.mxu3 }
 0x149   : > { %578 = vadd.xlane.f32.xlu1 %v560_v17  ;;  %576 = vadd.xlane.f32.xlu0 %v559_v18  ;;  %v551_v17 = vmax.f32 %v530_v12, 0.0 }
 0x14a   : > { %v499_v20 = vpop.f32.mrf.mxu2 }
 0x14b   : > { %v500_v21 = vadd.f32 %v499_v20, %v403_v16  ;;  %v436_v16 = vadd.f32 %v1466_v55, %v1469_v57 }
 0x14d   : > { %v541_v22 = vmax.f32 %v500_v21, 0.0  ;;  %v533_v19 = vadd.f32 %v532_v50, %v436_v16  ;;  %v571_v21 = vmul.f32 %v1477_v62, %v551_v17 }
 0x14f   : > { %v561_v24 = vmul.f32 %v1477_v62, %v541_v22  ;;  %v552_v22 = vmax.f32 %v533_v19, 0.0 }
 0x150   : > { %v535_v2 = vpop.f32.mrf.mxu3 }
 0x151   : > { %580 = vadd.xlane.f32.xlu1 %v561_v24  ;;  %v536_v4 = vadd.f32 %v535_v2, %v439_v63  ;;  %v1513_v24 = vld [vmem:[#allocation2] ss:$0 sm:$0xff] }
 0x152   : > { %v502_v25 = vpop.f32.mrf.mxu2 }
 0x153   : > { %v503_v27 = vadd.f32 %v502_v25, %v406_v23  ;;  %v553_v8 = vmax.f32 %v536_v4, 0.0  ;;  %v572_v23 = vmul.f32 %v1477_v62, %v552_v22 }
 0x155   : > { %v542_v28 = vmax.f32 %v503_v27, 0.0  ;;  %v573_v14 = vmul.f32 %v1477_v62, %v553_v8 }
 0x157   : > { %v562_v30 = vmul.f32 %v1477_v62, %v542_v28 }
 0x159   : > { %582 = vadd.xlane.f32.xlu2 %v562_v30 }
 0x15a   : > { %v505_v31 = vpop.f32.mrf.mxu2 }
 0x15b   : > { %v506_v32 = vadd.f32 %v505_v31, %v409_v29 }
 0x15d   : > { %v543_v34 = vmax.f32 %v506_v32, 0.0 }
 0x15f   : > { %v563_v36 = vmul.f32 %v1477_v62, %v543_v34 }
 0x161   : > { %584 = vadd.xlane.f32.xlu2 %v563_v36 }
 0x162   : > { %v508_v37 = vpop.f32.mrf.mxu2 }
 0x163   : > { %v509_v38 = vadd.f32 %v508_v37, %v412_v35 }
 0x165   : > { %v544_v39 = vmax.f32 %v509_v38, 0.0 }
 0x167   : > { %v564_v42 = vmul.f32 %v1477_v62, %v544_v39 }
 0x169   : > { %586 = vadd.xlane.f32.xlu0 %v564_v42 }
 0x16a   : > { %v511_v44 = vpop.f32.mrf.mxu2 }
 0x16b   : > { %v512_v45 = vadd.f32 %v511_v44, %v415_v41 }
 0x16d   : > { %v545_v46 = vmax.f32 %v512_v45, 0.0 }
 0x16f   : > { %v565_v48 = vmul.f32 %v1477_v62, %v545_v46 }
 0x171   : > { %588 = vadd.xlane.f32.xlu1 %v565_v48 }
 0x172   : > { %v514_v51 = vpop.f32.mrf.mxu2 }
 0x173   : > { %v515_v52 = vadd.f32 %v514_v51, %v418_v47 }
 0x175   : > { %v546_v54 = vmax.f32 %v515_v52, 0.0 }
 0x177   : > { %v566_v59 = vmul.f32 %v1477_v62, %v546_v54 }
 0x179   : > { %590 = vadd.xlane.f32.xlu2 %v566_v59 }
 0x17a   : > { %v517_v60 = vpop.f32.mrf.mxu2 }
 0x17b   : > { %v518_v0 = vadd.f32 %v517_v60, %v421_v56 }
 0x17d   : > { %v547_v3 = vmax.f32 %v518_v0, 0.0 }
 0x17f   : > { %v567_v5 = vmul.f32 %v1477_v62, %v547_v3 }
 0x181   : > { %592 = vadd.xlane.f32.xlu0 %v567_v5 }
 0x182   : > { %v520_v6 = vpop.f32.mrf.mxu2 }
 0x183   : > { %v521_v9 = vadd.f32 %v520_v6, %v424_v1 }
 0x185   : > { %v548_v11 = vmax.f32 %v521_v9, 0.0 }
 0x187   : > { %v568_v13 = vmul.f32 %v1477_v62, %v548_v11 }
 0x189   : > { %594 = vadd.xlane.f32.xlu1 %v568_v13  ;;  %604 = vadd.xlane.f32.xlu0 %v573_v14 }
 0x18a   : > { %v523_v15 = vpop.f32.mrf.mxu2 }
 0x18b   : > { %v524_v18 = vadd.f32 %v523_v15, %v427_v58 }
 0x18d   : > { %v549_v53 = vmax.f32 %v524_v18, 0.0 }
 0x18f   : > { %v569_v20 = vmul.f32 %v1477_v62, %v549_v53 }
 0x191   : > { %596 = vadd.xlane.f32.xlu2 %v569_v20  ;;  %600 = vadd.xlane.f32.xlu1 %v571_v21 }
 0x199   : > { %602 = vadd.xlane.f32.xlu2 %v572_v23 }
 0x1ac   : > { %v575_v25 = vpop.xlane.xlu0 %574 }
 0x1ad   : > { %v610_v26 = vadd.f32 %v1513_v24, %v575_v25 }
 0x1af   : > { %v1012_v55 = vmul.f32 -1.442695, %v610_v26 }
 0x1b1   : > { %1088 = vpow2.f32 %v1012_v55 }
 0x1b4   : > { %v599_v57 = vpop.xlane.xlu0 %598 }
 0x1b5   : > { %v622_v27 = vadd.f32 %v1513_v24, %v599_v57 }
 0x1b7   : > { %v1089_v28 = vpop.eup %1088  ;;  %v1024_v29 = vmul.f32 -1.442695, %v622_v27 }
 0x1b8   : > { %v674_v30 = vadd.f32 1.0, %v1089_v28 }
 0x1b9   : > { %1090 = vpow2.f32 %v1024_v29 }
 0x1ba   : > { %1092 = vrcp.f32 %v674_v30  ;;  %v701_v41 = vand.u32 2147483648, %v674_v30  ;;  %v699_v44 = vand.u32 2147483647, %v674_v30  ;;  %vm695_vm1 = vweird.f32 %v674_v30 }
 0x1bc   : > { %v579_v31 = vpop.xlane.xlu1 %578  ;;  %v577_v32 = vpop.xlane.xlu0 %576  ;;  %v702_v50 = vor.u32 1.1754944e-38, %v701_v41  ;;  %vm700_vm4 = vcmp.eq.f32.partialorder %v699_v44, 8.507059e+37 }
 0x1bd   : > { %v612_v62 = vadd.f32 %v1513_v24, %v579_v31  ;;  %v611_v33 = vadd.f32 %v1513_v24, %v577_v32 }
 0x1bf   : > { %v1091_v34 = vpop.eup %1090  ;;  %v1014_v35 = vmul.f32 -1.442695, %v612_v62  ;;  %v1013_v36 = vmul.f32 -1.442695, %v611_v33 }
 0x1c0   : > { %v1093_v37 = vpop.eup %1092  ;;  %v686_v38 = vadd.f32 1.0, %v1091_v34 }
 0x1c1   : > { %v691_v39 = vmul.f32 %v1093_v37, %v674_v30  ;;  %1094 = vpow2.f32 %v1014_v35  ;;  %vm696_vm0 = vweird.f32 %v1093_v37 }
 0x1c2   : > { %1096 = vrcp.f32 %v686_v38  ;;  %vm697_vm3 = vmor %vm695_vm1, %vm696_vm0  ;;  %vm875_vm5 = vweird.f32 %v686_v38  ;;  %v881_v60 = vand.u32 2147483648, %v686_v38  ;;  %v879_v63 = vand.u32 2147483647, %v686_v38 }
 0x1c3   : > { %v692_v40 = vsub.f32 1.0, %v691_v39  ;;  %1098 = vpow2.f32 %v1013_v36 }
 0x1c4   : > { %v581_v42 = vpop.xlane.xlu1 %580  ;;  %v882_v4 = vor.u32 1.1754944e-38, %v881_v60  ;;  %vm880_vm8 = vcmp.eq.f32.partialorder %v879_v63, 8.507059e+37 }
 0x1c5   : > { %v693_v43 = vmul.f32 %v1093_v37, %v692_v40  ;;  %v613_v45 = vadd.f32 %v1513_v24, %v581_v42 }
 0x1c7   : > { %v1095_v46 = vpop.eup %1094  ;;  %v694_v47 = vadd.f32 %v1093_v37, %v693_v43  ;;  %v1015_v48 = vmul.f32 -1.442695, %v613_v45 }
 0x1c8   : > { %v1097_v49 = vpop.eup %1096  ;;  %v676_v51 = vadd.f32 1.0, %v1095_v46 }
 0x1c9   : > { %v1099_v52 = vpop.eup %1098  ;;  %v698_v54 = vsel %vm697_vm3, %v1093_v37, %v694_v47  ;;  %v871_v56 = vmul.f32 %v1097_v49, %v686_v38  ;;  %1100 = vpow2.f32 %v1015_v48  ;;  %vm876_vm6 = vweird.f32 %v1097_v49 }
 0x1ca   : > { %v703_v59 = vsel %vm700_vm4, %v702_v50, %v698_v54  ;;  %1102 = vrcp.f32 %v676_v51  ;;  %v675_v0 = vadd.f32 1.0, %v1099_v52  ;;  %vm877_vm7 = vmor %vm875_vm5, %vm876_vm6  ;;  %v731_v14 = vand.u32 2147483648, %v676_v51 }
 0x1cb   : > { %931 = vst.msk [vmem:[%s1525_s20] sm:$0xff] %vm930_vm2, %v703_v59  ;;  %v872_v61 = vsub.f32 1.0, %v871_v56  ;;  %v729_v18 = vand.u32 2147483647, %v676_v51  ;;  %vm725_vm10 = vweird.f32 %v676_v51 }
 0x1cc   : > { %v583_v2 = vpop.xlane.xlu2 %582  ;;  %1104 = vrcp.f32 %v675_v0  ;;  %v714_v21 = vand.u32 2147483647, %v675_v0  ;;  %v716_v22 = vand.u32 2147483648, %v675_v0  ;;  %v732_v26 = vor.u32 1.1754944e-38, %v731_v14 }
 0x1cd   : > { %v873_v3 = vmul.f32 %v1097_v49, %v872_v61  ;;  %v614_v1 = vadd.f32 %v1513_v24, %v583_v2  ;;  %vm730_vm13 = vcmp.eq.f32.partialorder %v729_v18, 8.507059e+37  ;;  %vm710_vm14 = vweird.f32 %v675_v0 }
 0x1ce   : > { %vm715_vm0 = vcmp.eq.f32.partialorder %v714_v21, 8.507059e+37  ;;  %v717_v32 = vor.u32 1.1754944e-38, %v716_v22 }
 0x1cf   : > { %v1101_v5 = vpop.eup %1100  ;;  %v874_v6 = vadd.f32 %v1097_v49, %v873_v3  ;;  %v1016_v9 = vmul.f32 -1.442695, %v614_v1 }
 0x1d0   : > { %v1103_v7 = vpop.eup %1102  ;;  %v677_v8 = vadd.f32 1.0, %v1101_v5 }
 0x1d1   : > { %v878_v10 = vsel %vm877_vm7, %v1097_v49, %v874_v6  ;;  %v721_v11 = vmul.f32 %v1103_v7, %v676_v51  ;;  %vm726_vm9 = vweird.f32 %v1103_v7 }
 0x1d2   : > { %v883_v12 = vsel %vm880_vm8, %v882_v4, %v878_v10  ;;  %1106 = vrcp.f32 %v677_v8  ;;  %v1105_v58 = vpop.eup %1104  ;;  %vm727_vm11 = vmor %vm725_vm10, %vm726_vm9  ;;  %v744_v34 = vand.u32 2147483647, %v677_v8  ;;  %v746_v35 = vand.u32 2147483648, %v677_v8 }
 0x1d3   : > { %943 = vst.msk [vmem:[%s1525_s20 + $0x60] sm:$0xff] %vm930_vm2, %v883_v12  ;;  %v722_v13 = vsub.f32 1.0, %v721_v11  ;;  %1108 = vpow2.f32 %v1016_v9  ;;  %v706_v15 = vmul.f32 %v1105_v58, %v675_v0  ;;  %vm711_vm12 = vweird.f32 %v1105_v58 }
 0x1d4   : > { %v585_v16 = vpop.xlane.xlu2 %584  ;;  %vm712_vm15 = vmor %vm710_vm14, %vm711_vm12  ;;  %vm740_vm3 = vweird.f32 %v677_v8  ;;  %v747_v43 = vor.u32 1.1754944e-38, %v746_v35  ;;  %vm745_vm5 = vcmp.eq.f32.partialorder %v744_v34, 8.507059e+37 }
 0x1d5   : > { %v723_v17 = vmul.f32 %v1103_v7, %v722_v13  ;;  %v615_v53 = vadd.f32 %v1513_v24, %v585_v16  ;;  %v707_v19 = vsub.f32 1.0, %v706_v15 }
 0x1d7   : > { %v724_v20 = vadd.f32 %v1103_v7, %v723_v17  ;;  %v1017_v23 = vmul.f32 -1.442695, %v615_v53  ;;  %v708_v55 = vmul.f32 %v1105_v58, %v707_v19 }
 0x1d8   : > { %v1107_v25 = vpop.eup %1106 }
 0x1d9   : > { %v1109_v57 = vpop.eup %1108  ;;  %v728_v27 = vsel %vm727_vm11, %v1103_v7, %v724_v20  ;;  %v736_v28 = vmul.f32 %v1107_v25, %v677_v8  ;;  %1110 = vpow2.f32 %v1017_v23  ;;  %v709_v30 = vadd.f32 %v1105_v58, %v708_v55 }
 0x1da   : > { %v733_v29 = vsel %vm730_vm13, %v732_v26, %v728_v27  ;;  %v678_v31 = vadd.f32 1.0, %v1109_v57  ;;  %vm741_vm1 = vweird.f32 %v1107_v25 }
 0x1db   : > { %933 = vst.msk [vmem:[%s1525_s20 + $0x10] sm:$0xff] %vm930_vm2, %v733_v29  ;;  %v737_v62 = vsub.f32 1.0, %v736_v28  ;;  %v713_v33 = vsel %vm712_vm15, %v1105_v58, %v709_v30  ;;  %vm742_vm4 = vmor %vm740_vm3, %vm741_vm1 }
 0x1dc   : > { %1112 = vrcp.f32 %v678_v31  ;;  %v587_v36 = vpop.xlane.xlu0 %586  ;;  %v718_v37 = vsel %vm715_vm0, %v717_v32, %v713_v33  ;;  %v761_v52 = vand.u32 2147483648, %v678_v31  ;;  %v759_v59 = vand.u32 2147483647, %v678_v31 }
 0x1dd   : > { %v738_v38 = vmul.f32 %v1107_v25, %v737_v62  ;;  %v616_v39 = vadd.f32 %v1513_v24, %v587_v36  ;;  %932 = vst.msk [vmem:[%s1525_s20 + $0x8] sm:$0xff] %vm930_vm2, %v718_v37  ;;  %vm755_vm7 = vweird.f32 %v678_v31 }
 0x1de   : > { %v762_v3 = vor.u32 1.1754944e-38, %v761_v52  ;;  %vm760_vm9 = vcmp.eq.f32.partialorder %v759_v59, 8.507059e+37 }
 0x1df   : > { %v1111_v40 = vpop.eup %1110  ;;  %v739_v41 = vadd.f32 %v1107_v25, %v738_v38  ;;  %v1018_v42 = vmul.f32 -1.442695, %v616_v39 }
 0x1e0   : > { %v679_v44 = vadd.f32 1.0, %v1111_v40 }
 0x1e1   : > { %v743_v45 = vsel %vm742_vm4, %v1107_v25, %v739_v41  ;;  %1114 = vpow2.f32 %v1018_v42 }
 0x1e2   : > { %v1113_v46 = vpop.eup %1112  ;;  %v748_v47 = vsel %vm745_vm5, %v747_v43, %v743_v45  ;;  %1116 = vrcp.f32 %v679_v44  ;;  %v776_v6 = vand.u32 2147483648, %v679_v44  ;;  %v774_v9 = vand.u32 2147483647, %v679_v44 }
 0x1e3   : > { %934 = vst.msk [vmem:[%s1525_s20 + $0x18] sm:$0xff] %vm930_vm2, %v748_v47  ;;  %v751_v48 = vmul.f32 %v1113_v46, %v678_v31  ;;  %vm756_vm6 = vweird.f32 %v1113_v46  ;;  %vm770_vm11 = vweird.f32 %v679_v44 }
 0x1e4   : > { %v589_v49 = vpop.xlane.xlu1 %588  ;;  %vm757_vm8 = vmor %vm755_vm7, %vm756_vm6  ;;  %v777_v14 = vor.u32 1.1754944e-38, %v776_v6  ;;  %vm775_vm13 = vcmp.eq.f32.partialorder %v774_v9, 8.507059e+37 }
 0x1e5   : > { %v752_v50 = vsub.f32 1.0, %v751_v48  ;;  %v617_v51 = vadd.f32 %v1513_v24, %v589_v49 }
 0x1e7   : > { %v1115_v54 = vpop.eup %1114  ;;  %v753_v56 = vmul.f32 %v1113_v46, %v752_v50  ;;  %v1019_v60 = vmul.f32 -1.442695, %v617_v51 }
 0x1e8   : > { %v1117_v61 = vpop.eup %1116  ;;  %v680_v63 = vadd.f32 1.0, %v1115_v54 }
 0x1e9   : > { %v754_v0 = vadd.f32 %v1113_v46, %v753_v56  ;;  %v766_v2 = vmul.f32 %v1117_v61, %v679_v44  ;;  %1118 = vpow2.f32 %v1019_v60  ;;  %vm771_vm10 = vweird.f32 %v1117_v61 }
 0x1ea   : > { %1120 = vrcp.f32 %v680_v63  ;;  %vm772_vm12 = vmor %vm770_vm11, %vm771_vm10  ;;  %v791_v19 = vand.u32 2147483648, %v680_v63  ;;  %v789_v22 = vand.u32 2147483647, %v680_v63  ;;  %vm785_vm15 = vweird.f32 %v680_v63 }
 0x1eb   : > { %v758_v4 = vsel %vm757_vm8, %v1113_v46, %v754_v0  ;;  %v767_v1 = vsub.f32 1.0, %v766_v2 }
 0x1ec   : > { %v763_v5 = vsel %vm760_vm9, %v762_v3, %v758_v4  ;;  %v591_v7 = vpop.xlane.xlu2 %590  ;;  %v792_v27 = vor.u32 1.1754944e-38, %v791_v19  ;;  %vm790_vm1 = vcmp.eq.f32.partialorder %v789_v22, 8.507059e+37 }
 0x1ed   : > { %935 = vst.msk [vmem:[%s1525_s20 + $0x20] sm:$0xff] %vm930_vm2, %v763_v5  ;;  %v768_v8 = vmul.f32 %v1117_v61, %v767_v1  ;;  %v618_v10 = vadd.f32 %v1513_v24, %v591_v7 }
 0x1ef   : > { %v1119_v11 = vpop.eup %1118  ;;  %v769_v12 = vadd.f32 %v1117_v61, %v768_v8  ;;  %v1020_v58 = vmul.f32 -1.442695, %v618_v10 }
 0x1f0   : > { %v1121_v13 = vpop.eup %1120  ;;  %v681_v15 = vadd.f32 1.0, %v1119_v11 }
 0x1f1   : > { %v773_v16 = vsel %vm772_vm12, %v1117_v61, %v769_v12  ;;  %v781_v17 = vmul.f32 %v1121_v13, %v680_v63  ;;  %1122 = vpow2.f32 %v1020_v58  ;;  %vm786_vm14 = vweird.f32 %v1121_v13 }
 0x1f2   : > { %v778_v18 = vsel %vm775_vm13, %v777_v14, %v773_v16  ;;  %1124 = vrcp.f32 %v681_v15  ;;  %vm787_vm0 = vmor %vm785_vm15, %vm786_vm14  ;;  %v804_v62 = vand.u32 2147483647, %v681_v15  ;;  %v806_v33 = vand.u32 2147483648, %v681_v15 }
 0x1f3   : > { %936 = vst.msk [vmem:[%s1525_s20 + $0x28] sm:$0xff] %vm930_vm2, %v778_v18  ;;  %v782_v53 = vsub.f32 1.0, %v781_v17  ;;  %vm800_vm4 = vweird.f32 %v681_v15 }
 0x1f4   : > { %v593_v20 = vpop.xlane.xlu0 %592  ;;  %v807_v44 = vor.u32 1.1754944e-38, %v806_v33  ;;  %vm805_vm6 = vcmp.eq.f32.partialorder %v804_v62, 8.507059e+37 }
 0x1f5   : > { %v783_v21 = vmul.f32 %v1121_v13, %v782_v53  ;;  %v619_v23 = vadd.f32 %v1513_v24, %v593_v20 }
 0x1f7   : > { %v1123_v25 = vpop.eup %1122  ;;  %v784_v26 = vadd.f32 %v1121_v13, %v783_v21  ;;  %v1021_v55 = vmul.f32 -1.442695, %v619_v23 }
 0x1f8   : > { %v1125_v57 = vpop.eup %1124  ;;  %v682_v28 = vadd.f32 1.0, %v1123_v25 }
 0x1f9   : > { %v788_v29 = vsel %vm787_vm0, %v1121_v13, %v784_v26  ;;  %v796_v30 = vmul.f32 %v1125_v57, %v681_v15  ;;  %1126 = vpow2.f32 %v1021_v55  ;;  %vm801_vm3 = vweird.f32 %v1125_v57 }
 0x1fa   : > { %v793_v31 = vsel %vm790_vm1, %v792_v27, %v788_v29  ;;  %1128 = vrcp.f32 %v682_v28  ;;  %vm802_vm5 = vmor %vm800_vm4, %vm801_vm3  ;;  %v819_v50 = vand.u32 2147483647, %v682_v28  ;;  %v821_v51 = vand.u32 2147483648, %v682_v28 }
 0x1fb   : > { %937 = vst.msk [vmem:[%s1525_s20 + $0x30] sm:$0xff] %vm930_vm2, %v793_v31  ;;  %v797_v32 = vsub.f32 1.0, %v796_v30  ;;  %vm815_vm8 = vweird.f32 %v682_v28 }
 0x1fc   : > { %v595_v34 = vpop.xlane.xlu1 %594  ;;  %v605_v35 = vpop.xlane.xlu0 %604  ;;  %v822_v4 = vor.u32 1.1754944e-38, %v821_v51  ;;  %vm820_vm10 = vcmp.eq.f32.partialorder %v819_v50, 8.507059e+37 }
 0x1fd   : > { %v798_v36 = vmul.f32 %v1125_v57, %v797_v32  ;;  %v620_v37 = vadd.f32 %v1513_v24, %v595_v34  ;;  %v625_v38 = vadd.f32 %v1513_v24, %v605_v35 }
 0x1ff   : > { %v1127_v39 = vpop.eup %1126  ;;  %v799_v40 = vadd.f32 %v1125_v57, %v798_v36  ;;  %v1022_v41 = vmul.f32 -1.442695, %v620_v37  ;;  %v1027_v42 = vmul.f32 -1.442695, %v625_v38 }
 0x200   : > { %v1129_v43 = vpop.eup %1128  ;;  %v683_v45 = vadd.f32 1.0, %v1127_v39 }
 0x201   : > { %v803_v46 = vsel %vm802_vm5, %v1125_v57, %v799_v40  ;;  %v811_v47 = vmul.f32 %v1129_v43, %v682_v28  ;;  %1130 = vpow2.f32 %v1022_v41  ;;  %vm816_vm7 = vweird.f32 %v1129_v43 }
 0x202   : > { %v808_v48 = vsel %vm805_vm6, %v807_v44, %v803_v46  ;;  %1132 = vrcp.f32 %v683_v45  ;;  %vm817_vm9 = vmor %vm815_vm8, %vm816_vm7  ;;  %v836_v11 = vand.u32 2147483648, %v683_v45  ;;  %v834_v13 = vand.u32 2147483647, %v683_v45 }
 0x203   : > { %938 = vst.msk [vmem:[%s1525_s20 + $0x38] sm:$0xff] %vm930_vm2, %v808_v48  ;;  %v812_v49 = vsub.f32 1.0, %v811_v47  ;;  %1134 = vpow2.f32 %v1027_v42  ;;  %vm830_vm12 = vweird.f32 %v683_v45 }
 0x204   : > { %v597_v52 = vpop.xlane.xlu2 %596  ;;  %v601_v54 = vpop.xlane.xlu1 %600  ;;  %v837_v18 = vor.u32 1.1754944e-38, %v836_v11  ;;  %vm835_vm14 = vcmp.eq.f32.partialorder %v834_v13, 8.507059e+37 }
 0x205   : > { %v813_v56 = vmul.f32 %v1129_v43, %v812_v49  ;;  %v621_v59 = vadd.f32 %v1513_v24, %v597_v52  ;;  %v623_v60 = vadd.f32 %v1513_v24, %v601_v54 }
 0x207   : > { %v1131_v61 = vpop.eup %1130  ;;  %v814_v63 = vadd.f32 %v1129_v43, %v813_v56  ;;  %v1023_v0 = vmul.f32 -1.442695, %v621_v59  ;;  %v1025_v2 = vmul.f32 -1.442695, %v623_v60 }
 0x208   : > { %v1133_v3 = vpop.eup %1132  ;;  %v684_v1 = vadd.f32 1.0, %v1131_v61 }
 0x209   : > { %v1135_v5 = vpop.eup %1134  ;;  %v818_v6 = vsel %vm817_vm9, %v1129_v43, %v814_v63  ;;  %v826_v7 = vmul.f32 %v1133_v3, %v683_v45  ;;  %1136 = vpow2.f32 %v1023_v0  ;;  %vm831_vm11 = vweird.f32 %v1133_v3 }
 0x20a   : > { %v823_v8 = vsel %vm820_vm10, %v822_v4, %v818_v6  ;;  %1138 = vrcp.f32 %v684_v1  ;;  %v689_v10 = vadd.f32 1.0, %v1135_v5  ;;  %vm832_vm13 = vmor %vm830_vm12, %vm831_vm11  ;;  %v851_v55 = vand.u32 2147483648, %v684_v1 }
 0x20b   : > { %939 = vst.msk [vmem:[%s1525_s20 + $0x40] sm:$0xff] %vm930_vm2, %v823_v8  ;;  %v827_v9 = vsub.f32 1.0, %v826_v7  ;;  %1140 = vpow2.f32 %v1025_v2  ;;  %v849_v28 = vand.u32 2147483647, %v684_v1  ;;  %vm845_vm0 = vweird.f32 %v684_v1 }
 0x20c   : > { %v603_v12 = vpop.xlane.xlu2 %602  ;;  %1142 = vrcp.f32 %v689_v10  ;;  %v924_v31 = vand.u32 2147483647, %v689_v10  ;;  %v926_v32 = vand.u32 2147483648, %v689_v10  ;;  %v852_v33 = vor.u32 1.1754944e-38, %v851_v55 }
 0x20d   : > { %v828_v58 = vmul.f32 %v1133_v3, %v827_v9  ;;  %v624_v14 = vadd.f32 %v1513_v24, %v603_v12  ;;  %vm850_vm4 = vcmp.eq.f32.partialorder %v849_v28, 8.507059e+37  ;;  %vm920_vm5 = vweird.f32 %v689_v10 }
 0x20e   : > { %vm925_vm7 = vcmp.eq.f32.partialorder %v924_v31, 8.507059e+37  ;;  %v927_v42 = vor.u32 1.1754944e-38, %v926_v32 }
 0x20f   : > { %v1137_v15 = vpop.eup %1136  ;;  %v829_v16 = vadd.f32 %v1133_v3, %v828_v58  ;;  %v1026_v19 = vmul.f32 -1.442695, %v624_v14 }
 0x210   : > { %v1139_v17 = vpop.eup %1138  ;;  %v1558_v53 = vadd.f32 1.0, %v1137_v15 }
 0x211   : > { %v1141_v20 = vpop.eup %1140  ;;  %v833_v21 = vsel %vm832_vm13, %v1133_v3, %v829_v16  ;;  %v841_v22 = vmul.f32 %v1139_v17, %v684_v1  ;;  %vm846_vm15 = vweird.f32 %v1139_v17 }
 0x212   : > { %v838_v23 = vsel %vm835_vm14, %v837_v18, %v833_v21  ;;  %1144 = vrcp.f32 %v1558_v53  ;;  %v1143_v25 = vpop.eup %1142  ;;  %v687_v26 = vadd.f32 1.0, %v1141_v20  ;;  %vm847_vm1 = vmor %vm845_vm0, %vm846_vm15  ;;  %v866_v45 = vand.u32 2147483648, %v1558_v53 }
 0x213   : > { %940 = vst.msk [vmem:[%s1525_s20 + $0x48] sm:$0xff] %vm930_vm2, %v838_v23  ;;  %v842_v24 = vsub.f32 1.0, %v841_v22  ;;  %1146 = vpow2.f32 %v1026_v19  ;;  %v916_v57 = vmul.f32 %v1143_v25, %v689_v10  ;;  %vm921_vm3 = vweird.f32 %v1143_v25 }
 0x214   : > { %1148 = vrcp.f32 %v687_v26  ;;  %vm922_vm6 = vmor %vm920_vm5, %vm921_vm3  ;;  %v864_v49 = vand.u32 2147483647, %v1558_v53  ;;  %vm860_vm9 = vweird.f32 %v1558_v53  ;;  %v896_v52 = vand.u32 2147483648, %v687_v26 }
 0x215   : > { %v843_v27 = vmul.f32 %v1139_v17, %v842_v24  ;;  %v917_v29 = vsub.f32 1.0, %v916_v57  ;;  %v867_v54 = vor.u32 1.1754944e-38, %v866_v45  ;;  %v894_v59 = vand.u32 2147483647, %v687_v26 }
 0x216   : > { %vm865_vm12 = vcmp.eq.f32.partialorder %v864_v49, 8.507059e+37  ;;  %vm890_vm13 = vweird.f32 %v687_v26  ;;  %v897_v2 = vor.u32 1.1754944e-38, %v896_v52 }
 0x217   : > { %v844_v30 = vadd.f32 %v1139_v17, %v843_v27  ;;  %v918_v34 = vmul.f32 %v1143_v25, %v917_v29  ;;  %vm895_vm15 = vcmp.eq.f32.partialorder %v894_v59, 8.507059e+37 }
 0x218   : > { %v1145_v62 = vpop.eup %1144 }
 0x219   : > { %v1147_v35 = vpop.eup %1146  ;;  %v848_v36 = vsel %vm847_vm1, %v1139_v17, %v844_v30  ;;  %v856_v37 = vmul.f32 %v1145_v62, %v1558_v53  ;;  %v919_v39 = vadd.f32 %v1143_v25, %v918_v34  ;;  %vm861_vm8 = vweird.f32 %v1145_v62 }
 0x21a   : > { %v853_v38 = vsel %vm850_vm4, %v852_v33, %v848_v36  ;;  %v688_v40 = vadd.f32 1.0, %v1147_v35  ;;  %v1149_v41 = vpop.eup %1148  ;;  %vm862_vm10 = vmor %vm860_vm9, %vm861_vm8 }
 0x21b   : > { %941 = vst.msk [vmem:[%s1525_s20 + $0x50] sm:$0xff] %vm930_vm2, %v853_v38  ;;  %v857_v43 = vsub.f32 1.0, %v856_v37  ;;  %v923_v44 = vsel %vm922_vm6, %v1143_v25, %v919_v39  ;;  %v886_v46 = vmul.f32 %v1149_v41, %v687_v26  ;;  %vm891_vm11 = vweird.f32 %v1149_v41 }
 0x21c   : > { %1150 = vrcp.f32 %v688_v40  ;;  %v928_v47 = vsel %vm925_vm7, %v927_v42, %v923_v44  ;;  %vm892_vm14 = vmor %vm890_vm13, %vm891_vm11  ;;  %v911_v6 = vand.u32 2147483648, %v688_v40  ;;  %v909_v8 = vand.u32 2147483647, %v688_v40 }
 0x21d   : > { %v858_v48 = vmul.f32 %v1145_v62, %v857_v43  ;;  %946 = vst.msk [vmem:[%s1525_s20 + $0x78] sm:$0xff] %vm930_vm2, %v928_v47  ;;  %v887_v50 = vsub.f32 1.0, %v886_v46  ;;  %vm905_vm1 = vweird.f32 %v688_v40 }
 0x21e   : > { %v912_v10 = vor.u32 1.1754944e-38, %v911_v6  ;;  %vm910_vm4 = vcmp.eq.f32.partialorder %v909_v8, 8.507059e+37 }
 0x21f   : > { %v859_v51 = vadd.f32 %v1145_v62, %v858_v48  ;;  %v888_v56 = vmul.f32 %v1149_v41, %v887_v50 }
 0x221   : > { %v863_v60 = vsel %vm862_vm10, %v1145_v62, %v859_v51  ;;  %v889_v0 = vadd.f32 %v1149_v41, %v888_v56 }
 0x222   : > { %v1151_v61 = vpop.eup %1150  ;;  %v868_v63 = vsel %vm865_vm12, %v867_v54, %v863_v60 }
 0x223   : > { %942 = vst.msk [vmem:[%s1525_s20 + $0x58] sm:$0xff] %vm930_vm2, %v868_v63  ;;  %v901_v3 = vmul.f32 %v1151_v61, %v688_v40  ;;  %v893_v4 = vsel %vm892_vm14, %v1149_v41, %v889_v0  ;;  %vm906_vm0 = vweird.f32 %v1151_v61 }
 0x224   : > { %v898_v1 = vsel %vm895_vm15, %v897_v2, %v893_v4  ;;  %vm907_vm3 = vmor %vm905_vm1, %vm906_vm0 }
 0x225   : > { %v902_v5 = vsub.f32 1.0, %v901_v3  ;;  %944 = vst.msk [vmem:[%s1525_s20 + $0x68] sm:$0xff] %vm930_vm2, %v898_v1 }
 0x227   : > { %v903_v7 = vmul.f32 %v1151_v61, %v902_v5 }
 0x229   : > { %v904_v9 = vadd.f32 %v1151_v61, %v903_v7 }
 0x22b   : > { %v908_v11 = vsel %vm907_vm3, %v1151_v61, %v904_v9 }
 0x22c   : > { %v913_v12 = vsel %vm910_vm4, %v912_v10, %v908_v11 }
 0x22d   : > { %945 = vst.msk [vmem:[%s1525_s20 + $0x70] sm:$0xff] %vm930_vm2, %v913_v12 }
 0x22e PF: > { %s18_s23 = sadd.s32 1, %s1158_s23  }
 0x22f   : > { %p15_p4 = scmp.ge.s32.totalorder %s18_s23, 5  }
 0x231   :  { %17 = sbr.rel (!%p15_p4) target bundleno = 3 (0x3), region = 74 }

</bundles_post_ra>
